<compile_context>
chip_gen: v7x
topology: tpu7x:2x2x1
jax: 0.10.0
libtpu: 0.0.40
codegen_flags: <defaults>
</compile_context>

<pallas_src>
import functools

import jax
import jax.numpy as jnp
from jax.experimental import pallas as pl
from jax.experimental.pallas import tpu as pltpu


def _round_up(x: int, m: int) -> int:
    return (x + m - 1) // m * m


def _pick_row_tile(n: int) -> int:
    """Largest nice divisor of N (multiple of 8, <= 512); fall back to full N."""
    for cand in (512, 256, 128, 64, 32, 16, 8):
        if n % cand == 0:
            return cand
    return n  # full dim is always a legal block extent


def gcn_kernel(text_ref, adj_ref, w_ref, b_ref, out_ref, hid_ref, *, f_out):
    """One (batch, row-tile) grid step.

    text_ref: (N, F_in)       bf16   full per-batch node features
    adj_ref:  (tn, N)         bf16   row tile of adjacency
    w_ref:    (F_in, F_out_p) bf16   zero-padded weight
    b_ref:    (1, F_out_p)    f32    zero-padded bias
    out_ref:  (tn, F_out_p)   f32    lane-dense output tile
    hid_ref:  (N, F_out_p)    bf16   scratch: [hidden | ones | 0...], per batch
    """
    # Compute hidden once per batch (row-tile 0), cache it in VMEM scratch.
    @pl.when(pl.program_id(1) == 0)
    def _():
        h = jnp.dot(text_ref[...], w_ref[...],
                    preferred_element_type=jnp.float32)
        # Write a ones-column at lane `f_out` so the aggregation matmul also
        # yields the adjacency row-sum (the denom) for free.
        col = jax.lax.broadcasted_iota(jnp.int32, h.shape, 1)
        h = jnp.where(col == f_out, 1.0, h)
        hid_ref[...] = h.astype(hid_ref.dtype)

    # Fused aggregation: res[:, :F_out] = adj @ hidden, res[:, F_out] = row-sum.
    res = jnp.dot(adj_ref[...], hid_ref[...],
                  preferred_element_type=jnp.float32)

    denom = res[:, f_out:f_out + 1] + 1.0          # (tn, 1), exact (adj ints)
    inv = pl.reciprocal(denom, approx=True)        # EUP slot, not VALU divide
    out = res * inv + b_ref[...]                   # broadcasted VALU mul + add
    out_ref[...] = out.astype(out_ref.dtype)


def graph_convolution(text, adj, weight, bias=None):
    """text: [B, N, F_in], adj: [B, N, N], weight: [F_in, F_out], bias: [F_out]."""
    B, N, F_in = text.shape
    F_out = weight.shape[1]
    out_dtype = text.dtype

    # Lane-dense padded output-feature dim; +1 reserves a lane for the fused
    # row-sum ("ones") column.
    F_out_p = _round_up(F_out + 1, 128)

    # bf16 MXU operands (f32 accumulate happens inside the kernel).  In a real
    # pipeline the caller should already hold these in bf16 to also halve the
    # HBM stream for the N^2 adjacency.
    text_b = text.astype(jnp.bfloat16)
    adj_b = adj.astype(jnp.bfloat16)
    w_p = jnp.zeros((F_in, F_out_p), jnp.bfloat16)
    w_p = w_p.at[:, :F_out].set(weight.astype(jnp.bfloat16))
    b_p = jnp.zeros((1, F_out_p), jnp.float32)
    if bias is not None:
        b_p = b_p.at[0, :F_out].set(bias.astype(jnp.float32))

    tn = _pick_row_tile(N)
    grid = (B, N // tn)

    kernel = functools.partial(gcn_kernel, f_out=F_out)

    out_p = pl.pallas_call(
        kernel,
        out_shape=jax.ShapeDtypeStruct((B, N, F_out_p), out_dtype),
        grid_spec=pltpu.PrefetchScalarGridSpec(
            num_scalar_prefetch=0,
            grid=grid,
            in_specs=[
                # Full per-batch text block; index_map ignores the row-tile
                # axis so it stays resident across row tiles.
                pl.BlockSpec((None, N, F_in), lambda b, j: (b, 0, 0)),
                # Row tile of the adjacency: (tn, N).
                pl.BlockSpec((None, tn, N), lambda b, j: (b, j, 0)),
                # Grid-invariant weight / bias.
                pl.BlockSpec((F_in, F_out_p), lambda b, j: (0, 0)),
                pl.BlockSpec((1, F_out_p), lambda b, j: (0, 0)),
            ],
            out_specs=pl.BlockSpec((None, tn, F_out_p), lambda b, j: (b, j, 0)),
            # Cached [hidden | ones] slab, persists across row tiles of a batch.
            scratch_shapes=[pltpu.VMEM((N, F_out_p), jnp.bfloat16)],
        ),
        compiler_params=pltpu.CompilerParams(
            # Row-tile axis must be "arbitrary": the hidden scratch is filled
            # at row-tile 0 and reused by later tiles on the same core.
            dimension_semantics=("parallel", "arbitrary"),
        ),
    )(text_b, adj_b, w_p, b_p)

    # Strip the feature padding (ones column + zero lanes) outside the kernel.
    return out_p[..., :F_out]


if __name__ == "__main__":
    # Small shapes consistent with a GCN over a token graph.
    B, N = 2, 8            # batch, number of nodes (sequence length)
    F_in, F_out = 32, 32   # in_features, out_features

    key = jax.random.PRNGKey(0)
    k_text, k_adj, k_w, k_b = jax.random.split(key, 4)

    text = jax.random.normal(k_text, (B, N, F_in), dtype=jnp.float32)
    # Binary-ish adjacency with self loops, like a typical GCN input.
    adj_raw = jax.random.uniform(k_adj, (B, N, N), dtype=jnp.float32)
    adj = (adj_raw > 0.5).astype(jnp.float32) + jnp.eye(N, dtype=jnp.float32)[None]

    limit = (6.0 / (F_in + F_out)) ** 0.5
    weight = jax.random.uniform(k_w, (F_in, F_out), minval=-limit, maxval=limit,
                                dtype=jnp.float32)
    bias = jax.random.uniform(k_b, (F_out,), minval=-0.1, maxval=0.1,
                              dtype=jnp.float32)

    out = graph_convolution(text, adj, weight, bias)
    out = jax.block_until_ready(out)

    # Reference (exact torch semantics, f32).  Tolerance is loosened because
    # the kernel uses bf16 MXU inputs (f32 accumulate) and an approx reciprocal.
    hidden_ref = jnp.matmul(text, weight)
    denom_ref = jnp.sum(adj, axis=2, keepdims=True) + 1.0
    ref = jnp.matmul(adj, hidden_ref) / denom_ref + bias

    assert out.shape == (B, N, F_out)
    assert jnp.allclose(out, ref, atol=2e-2, rtol=2e-2), "mismatch vs reference"

    print("KERNEL_OK")
</pallas_src>

<mosaic_0001>
module attributes {stable_mosaic.version = 11 : i64} {
  func.func @gcn_kernel(%arg0: i32, %arg1: i32, %arg2: memref<1x8x32xbf16, #tpu.memory_space<vmem>>, %arg3: memref<1x8x8xbf16, #tpu.memory_space<vmem>>, %arg4: memref<32x128xbf16, #tpu.memory_space<vmem>>, %arg5: memref<1x128xf32, #tpu.memory_space<vmem>>, %arg6: memref<1x8x128xf32, #tpu.memory_space<vmem>>, %arg7: memref<8x128xbf16, #tpu.memory_space<vmem>>) attributes {dimension_semantics = [#tpu.dimension_semantics<parallel>, #tpu.dimension_semantics<arbitrary>], iteration_bounds = array<i64: 2, 1>, scalar_prefetch = 0 : i64, scratch_operands = 1 : i64, tpu.core_type = #tpu.core_type<tc>, window_params = [{transform_indices = @transform_0, window_bounds = array<i64: 1, 8, 32>}, {transform_indices = @transform_1, window_bounds = array<i64: 1, 8, 8>}, {pipeline_mode = #tpu.pipeline_mode<synchronous>, transform_indices = @transform_2, window_bounds = array<i64: 32, 128>}, {pipeline_mode = #tpu.pipeline_mode<synchronous>, transform_indices = @transform_3, window_bounds = array<i64: 1, 128>}, {transform_indices = @transform_4, window_bounds = array<i64: 1, 8, 128>}]} {
    %c0_i32 = arith.constant 0 : i32
    %0 = arith.cmpi eq, %arg1, %c0_i32 : i32
    %1 = arith.extui %0 : i1 to i32
    %c0_i32_0 = arith.constant 0 : i32
    %2 = arith.cmpi ne, %1, %c0_i32_0 : i32
    scf.if %2 {
      %c0_11 = arith.constant 0 : index
      %c0_12 = arith.constant 0 : index
      %c0_13 = arith.constant 0 : index
      %19 = vector.load %arg2[%c0_11, %c0_12, %c0_13] : memref<1x8x32xbf16, #tpu.memory_space<vmem>>, vector<1x8x32xbf16>
      %20 = vector.shape_cast %19 : vector<1x8x32xbf16> to vector<8x32xbf16>
      %c0_14 = arith.constant 0 : index
      %c0_15 = arith.constant 0 : index
      %21 = vector.load %arg4[%c0_14, %c0_15] : memref<32x128xbf16, #tpu.memory_space<vmem>>, vector<32x128xbf16>
      %cst_16 = arith.constant dense<0.000000e+00> : vector<8x128xf32>
      %22 = tpu.matmul %20, %21, %cst_16 {dimension_numbers = #tpu.dot_dimension_numbers<[1], [0], [0], [1], [0, 0, 1, 1], [], []>} : vector<8x32xbf16>, vector<32x128xbf16>, vector<8x128xf32> -> vector<8x128xf32>
      %23 = tpu.iota {dimensions = array<i32: 1>} : vector<8x128xi32>
      %c32_i32 = arith.constant 32 : i32
      %24 = vector.broadcast %c32_i32 : i32 to vector<8x128xi32>
      %25 = arith.cmpi eq, %23, %24 : vector<8x128xi32>
      %cst_17 = arith.constant 1.000000e+00 : f32
      %26 = vector.broadcast %cst_17 : f32 to vector<8x128xf32>
      %27 = arith.select %25, %26, %22 : vector<8x128xi1>, vector<8x128xf32>
      %28 = arith.truncf %27 : vector<8x128xf32> to vector<8x128xbf16>
      %c0_18 = arith.constant 0 : index
      %c0_19 = arith.constant 0 : index
      %29 = vector.load %arg7[%c0_18, %c0_19] : memref<8x128xbf16, #tpu.memory_space<vmem>>, vector<8x128xbf16>
      tpu.vector_store %arg7[%c0_18, %c0_19], %28 {strides = array<i32>} : memref<8x128xbf16, #tpu.memory_space<vmem>>, vector<8x128xbf16>,
    } else {
    }
    %c0 = arith.constant 0 : index
    %c0_1 = arith.constant 0 : index
    %c0_2 = arith.constant 0 : index
    %3 = vector.load %arg3[%c0, %c0_1, %c0_2] : memref<1x8x8xbf16, #tpu.memory_space<vmem>>, vector<1x8x8xbf16>
    %4 = vector.shape_cast %3 : vector<1x8x8xbf16> to vector<8x8xbf16>
    %c0_3 = arith.constant 0 : index
    %c0_4 = arith.constant 0 : index
    %5 = vector.load %arg7[%c0_3, %c0_4] : memref<8x128xbf16, #tpu.memory_space<vmem>>, vector<8x128xbf16>
    %cst = arith.constant dense<0.000000e+00> : vector<8x128xf32>
    %6 = tpu.matmul %4, %5, %cst {dimension_numbers = #tpu.dot_dimension_numbers<[1], [0], [0], [1], [0, 0, 1, 1], [], []>} : vector<8x8xbf16>, vector<8x128xbf16>, vector<8x128xf32> -> vector<8x128xf32>
    %7 = vector.extract_strided_slice %6 {offsets = [0, 32], sizes = [8, 1], strides = [1, 1]} : vector<8x128xf32> to vector<8x1xf32>
    %cst_5 = arith.constant 1.000000e+00 : f32
    %8 = vector.broadcast %cst_5 : f32 to vector<8x1xf32>
    %9 = arith.addf %7, %8 : vector<8x1xf32>
    %10 = tpu.reciprocal %9 {approx = true} : vector<8x1xf32> -> vector<8x1xf32>
    %11 = vector.broadcast %10 : vector<8x1xf32> to vector<8x128xf32>
    %12 = arith.mulf %6, %11 : vector<8x128xf32>
    %c0_6 = arith.constant 0 : index
    %c0_7 = arith.constant 0 : index
    %13 = vector.load %arg5[%c0_6, %c0_7] : memref<1x128xf32, #tpu.memory_space<vmem>>, vector<1x128xf32>
    %14 = vector.broadcast %13 : vector<1x128xf32> to vector<8x128xf32>
    %15 = arith.addf %12, %14 : vector<8x128xf32>
    %c0_8 = arith.constant 0 : index
    %c0_9 = arith.constant 0 : index
    %c0_10 = arith.constant 0 : index
    %16 = vector.load %arg6[%c0_8, %c0_9, %c0_10] : memref<1x8x128xf32, #tpu.memory_space<vmem>>, vector<1x8x128xf32>
    %17 = vector.shape_cast %16 : vector<1x8x128xf32> to vector<8x128xf32>
    %18 = vector.shape_cast %15 : vector<8x128xf32> to vector<1x8x128xf32>
    tpu.vector_store %arg6[%c0_8, %c0_9, %c0_10], %18 {strides = array<i32>} : memref<1x8x128xf32, #tpu.memory_space<vmem>>, vector<1x8x128xf32>,
    return
  }
  func.func @transform_0(%arg0: i32, %arg1: i32) -> (i32, i32, i32) {
    %c0_i32 = arith.constant 0 : i32
    %c0_i32_0 = arith.constant 0 : i32
    %c0_i32_1 = arith.constant 0 : i32
    return %arg0, %c0_i32, %c0_i32_0 : i32, i32, i32
  }
  func.func @transform_1(%arg0: i32, %arg1: i32) -> (i32, i32, i32) {
    %c0_i32 = arith.constant 0 : i32
    %c0_i32_0 = arith.constant 0 : i32
    return %arg0, %arg1, %c0_i32 : i32, i32, i32
  }
  func.func @transform_2(%arg0: i32, %arg1: i32) -> (i32, i32) {
    %c0_i32 = arith.constant 0 : i32
    %c0_i32_0 = arith.constant 0 : i32
    %c0_i32_1 = arith.constant 0 : i32
    return %c0_i32, %c0_i32_0 : i32, i32
  }
  func.func @transform_3(%arg0: i32, %arg1: i32) -> (i32, i32) {
    %c0_i32 = arith.constant 0 : i32
    %c0_i32_0 = arith.constant 0 : i32
    %c0_i32_1 = arith.constant 0 : i32
    return %c0_i32, %c0_i32_0 : i32, i32
  }
  func.func @transform_4(%arg0: i32, %arg1: i32) -> (i32, i32, i32) {
    %c0_i32 = arith.constant 0 : i32
    %c0_i32_0 = arith.constant 0 : i32
    return %arg0, %arg1, %c0_i32 : i32, i32, i32
  }
}

</mosaic_0001>

<bundles_post_ra>
// kernel: tpu_custom_call.1
= control target key start
LH: loop header
LB: loop body
LE: loop exit
PB: predicated region body
PF: predicated region fallthrough
CT: control target
= control target key end

     0   :  { %s1144_s0 = inlined_call_operand.hbm [shape: bf16[2,8,32], index: 0, kind: input, shape index: {}]   ;;  %s1145_s1 = inlined_call_operand.hbm [shape: bf16[2,8,8], index: 1, kind: input, shape index: {}]   ;;  %s1146_s2 = inlined_call_operand.hbm [shape: bf16[32,128], index: 2, kind: input, shape index: {}]   ;;  %s1147_s3 = inlined_call_operand.vmem [shape: f32[1,128], index: 3, kind: input, shape index: {}]   ;;  %s1148_s4 = inlined_call_operand.hbm [shape: f32[2,8,128], index: 4, kind: output, shape index: {}]  }
   0x1   :  { %1155 = sst [smem:[#allocation16_spill]] %s1146_s2 }
   0x2   :  { %9 = vsyncpa [#allocation4], 0 }
   0x3   :  { %11 = vsyncpa [#allocation4 + $0x1], 0 }
   0x4   :  { %12 = vsyncpa [#allocation7], 0 }
   0x5   :  { %14 = vsyncpa [#allocation7 + $0x1], 0 }
   0x6   :  { %15 = vsyncpa [#allocation5], 0 }
   0x7   :  { %17 = vsyncpa [#allocation5 + $0x1], 0  ;;  %s891_s15 = smov 0   ;;  %s893_s16 = smov 0  }
   0x8   :  { %s895_s17 = smov 0   ;;  %s897_s18 = smov 0  }
   0x9   :  { %s899_s19 = smov 0   ;;  %s901_s20 = smov 0  }
   0xa LB: > { %1156 = sst [smem:[#allocation14_spill]] %s851_s19  ;;  %s922_s21 = sadd.s32 4294967295, %s855_s20   ;;  %s855_s20 = sphi %s901_s20, %s23_s20   ;;  %s851_s19 = sphi %s899_s19, %s1175_s19   ;;  %s847_s18 = sphi %s897_s18, %s1174_s18   ;;  %s843_s17 = sphi %s895_s17, %s1178_s17   ;;  %s839_s16 = sphi %s893_s16, %s1177_s16   ;;  %s835_s15 = sphi %s891_s15, %s1176_s15  }
   0xb   : > { %s548_s22 = sadd.s32 4294967294, %s855_s20   ;;  %p55_p0 = scmp.ne.s32.totalorder %s839_s16, %s835_s15 }
   0xc   : > { %p1149_p1 = scmp.eq.s32.totalorder %s922_s21, 0  ;;  %p157_p3 = scmp.eq.s32.totalorder %s548_s22, 1 }
   0xd   : > { %p549_p5 = scmp.ge.s32.totalorder %s855_s20, 1  ;;  %p164_p7 = scmp.lt.s32.totalorder %s855_s20, 3 }
   0xe   : > { %p931_p4 = por %p1149_p1, %p55_p0  ;;  %p936_p6 = por %p157_p3, %p55_p0 }
   0xf   : > { %p941_p8 = pnand %p549_p5, %p164_p7  ;;  %s857_s26 = smov [#allocation8]  }
  0x10   : > { %s1157_s23 = scalar_select %p931_p4, 1, 0 }
  0x11   : > { %s1158_s24 = scalar_select %p936_p6, 1, 0 }
  0x12   : > { %s1159_s25 = scalar_select %p941_p8, 1, 0 }
  0x13   : > { %s176_s27 = sshll.u32 %s857_s26, 4  ;;  %p599_p9 = pneg %p941_p8  ;;  %s177_s27 = int_to_ptr.vmem [resolvable:$true] %s176_s27 }
  0x14   : > { %s35_s29 = sadd.s32 1, %s851_s19  ;;  %s1161_s2 = sld [smem:[#allocation16_spill]] }
  0x15   : > { %p950_p11 = pnand %p599_p9, %p1149_p1 }
  0x17   : > { %p679_p13 = pneg %p950_p11 }
  0x1a   : > { %s677_s6 = scalar_lea.hbm %s1161_s2, 256 }
  0x1b   : > { %p678_p12 = scmp.ne.s32.totalorder %s1161_s2, %s677_s6  ;;  %p684_p5 = scmp.lt.u32.totalorder %s677_s6, %s1161_s2 }
  0x1d   : > { %p680_p0 = pnand %p679_p13, %p678_p12 }
  0x1f   : > { %p681_p3 = pneg %p680_p0 }
  0x21   : > { %p686_p7 = pnand %p684_p5, %p681_p3 }
  0x23   : > { %689 = shalt.err (!%p686_p7)
}
  0x24   : > { %s690_s11 = scalar_lea.vmem %s177_s27, 256  ;;  %p698_p2 = scmp.lt.s32.totalorder %s177_s27, %s177_s27 }
  0x25   : > { %p691_p9 = scmp.ne.s32.totalorder %s177_s27, %s690_s11  ;;  %p699_p6 = scmp.lt.s32.totalorder %s690_s11, %s690_s11 }
  0x27   : > { %p693_p10 = pnand %p691_p9, %p679_p13  ;;  %p700_p4 = por %p699_p6, %p698_p2 }
  0x29   : > { %p694_p1 = pneg %p693_p10 }
  0x2b   : > { %p701_p8 = pnand %p700_p4, %p694_p1 }
  0x2d   : > { %704 = shalt.err (!%p701_p8)
}
  0x2e   : > { %s858_s12 = smov 64   ;;  %s859_s13 = smov 4  }
  0x2f   : > { %602 = dma.hbm_to_vmem [thread:$0]  (!%p950_p11), %s1161_s2, 256, %s177_s27, [#allocation7], %s858_s12, %s858_s12, %s859_s13  }
  0x30   : > { %p37_p1 = scmp.ge.s32.totalorder %s35_s29, 2  ;;  %s42_s26 = sadd.s32 1, %s843_s17 }
  0x31   : > { %p49_p2 = scmp.ne.s32.totalorder %s843_s17, %s839_s16  ;;  %p50_p4 = scmp.eq.s32.totalorder %s855_s20, 0 }
  0x32   : > { %s1180_s29 = smov (%p37_p1, %s35_s29), 0  ;;  %p1164_p8 = scmp.eq.s32.totalorder %s922_s21, 1 }
  0x33   : > { %1162 = sst [smem:[#allocation15_spill]] %s1180_s29  ;;  %p977_p6 = por %p50_p4, %p49_p2 }
  0x34   : > { %p983_p10 = por %p1164_p8, %p49_p2  ;;  %s39_s5 = ssub.s32 %s851_s19, %s1180_s29 }
  0x35   : > { %p615_p11 = scmp.lt.s32.totalorder %s855_s20, 2  ;;  %p40_p12 = scmp.eq.s32.totalorder %s39_s5, 0 }
  0x36   : > { %s1165_s28 = scalar_select %p983_p10, 1, 0 }
  0x37   : > { %s193_s27 = sand.u32 1, %s843_s17   ;;  %s553_s8 = sshll.u32 %s851_s19, 6 }
  0x38   : > { %s991_s6 = sshll.u32 %s193_s27, 2  ;;  %s1000_s11 = scalar_lea.hbm %s1144_s0, %s553_s8 }
  0x39   : > { %s994_s7 = scalar_select %p40_p12, %s843_s17, %s42_s26  }
  0x3a   : > { %s197_s12 = scalar_lea.vmem [#allocation3], %s991_s6  ;;  %p1007_p13 = pnand %p615_p11, %p977_p6 }
  0x3b   : > { %s204_s13 = sshll.u32 %s197_s12, 4  ;;  %s1014_s5 = scalar_lea.hbm %s1145_s1, %s553_s8  ;;  %s1003_s13 = int_to_ptr.vmem [resolvable:$true] %s204_s13 }
  0x3c   : > { %s211_s9 = sand.u32 1, %s855_s20   ;;  %s194_s10 = scalar_lea.sflag [#allocation4], %s193_s27 }
  0x3d   : > { %s705_s2 = scalar_lea.hbm %s1000_s11, 64  ;;  %p707_p3 = pneg %p1007_p13 }
  0x3e   : > { %p706_p0 = scmp.ne.s32.totalorder %s1000_s11, %s705_s2  ;;  %s710_s29 = scalar_lea.hbm %s1144_s0, 128 }
  0x3f   : > { %p711_p9 = scmp.lt.u32.totalorder %s1000_s11, %s1144_s0  ;;  %p712_p1 = scmp.lt.u32.totalorder %s710_s29, %s705_s2 }
  0x40   : > { %p708_p5 = pnand %p707_p3, %p706_p0  ;;  %p714_p4 = scmp.lt.u32.totalorder %s705_s2, %s1000_s11 }
  0x41   : > { %p713_p2 = por %p712_p1, %p711_p9 }
  0x42   : > { %p709_p7 = pneg %p708_p5 }
  0x43   : > { %p715_p6 = por %p714_p4, %p713_p2 }
  0x45   : > { %p716_p8 = pnand %p715_p6, %p709_p7 }
  0x47   : > { %719 = shalt.err (!%p716_p8)
}
  0x48   : > { %s720_s27 = scalar_lea.vmem %s1003_s13, 64  ;;  %s860_s8 = smov [#allocation3]  }
  0x49   : > { %p721_p11 = scmp.ne.s32.totalorder %s1003_s13, %s720_s27  ;;  %s725_s26 = sshll.u32 %s860_s8, 4  ;;  %s726_s26 = int_to_ptr.vmem [resolvable:$false] %s725_s26 }
  0x4a   : > { %s727_s19 = scalar_lea.vmem %s726_s26, 128  ;;  %p728_p5 = scmp.lt.s32.totalorder %s1003_s13, %s726_s26 }
  0x4b   : > { %p723_p12 = pnand %p721_p11, %p707_p3  ;;  %p729_p9 = scmp.lt.s32.totalorder %s727_s19, %s720_s27 }
  0x4d   : > { %p724_p0 = pneg %p723_p12  ;;  %p730_p1 = por %p729_p9, %p728_p5 }
  0x4f   : > { %p731_p2 = pnand %p730_p1, %p724_p0 }
  0x51   : > { %734 = shalt.err (!%p731_p2)
}
  0x52   : > { %606 = dma.hbm_to_vmem [thread:$0]  (!%p1007_p13), %s1000_s11, 64, %s1003_s13, %s194_s10  }
  0x53   : > { %s215_s2 = scalar_lea.vmem [#allocation6], %s991_s6  ;;  %s212_s30 = scalar_lea.sflag [#allocation7], %s211_s9 }
  0x54   : > { %s223_s29 = sshll.u32 %s215_s2, 4  ;;  %s735_s12 = scalar_lea.hbm %s1014_s5, 64  ;;  %s224_s29 = int_to_ptr.vmem [resolvable:$true] %s223_s29 }
  0x55   : > { %p736_p7 = scmp.ne.s32.totalorder %s1014_s5, %s735_s12  ;;  %s740_s8 = scalar_lea.hbm %s1145_s1, 128 }
  0x56   : > { %p741_p8 = scmp.lt.u32.totalorder %s1014_s5, %s1145_s1  ;;  %p742_p11 = scmp.lt.u32.totalorder %s740_s8, %s735_s12 }
  0x57   : > { %p738_p4 = pnand %p736_p7, %p707_p3  ;;  %p744_p0 = scmp.lt.u32.totalorder %s735_s12, %s1014_s5 }
  0x58   : > { %p743_p12 = por %p742_p11, %p741_p8 }
  0x59   : > { %p739_p6 = pneg %p738_p4 }
  0x5a   : > { %p745_p5 = por %p744_p0, %p743_p12 }
  0x5c   : > { %p746_p9 = pnand %p745_p5, %p739_p6 }
  0x5e   : > { %749 = shalt.err (!%p746_p9)
}
  0x5f   : > { %s750_s6 = scalar_lea.vmem %s224_s29, 64  ;;  %s861_s11 = smov [#allocation6]  }
  0x60   : > { %p751_p1 = scmp.ne.s32.totalorder %s224_s29, %s750_s6  ;;  %s755_s13 = sshll.u32 %s861_s11, 4  ;;  %s756_s13 = int_to_ptr.vmem [resolvable:$false] %s755_s13 }
  0x61   : > { %s757_s9 = scalar_lea.vmem %s756_s13, 128  ;;  %p758_p4 = scmp.lt.s32.totalorder %s224_s29, %s756_s13 }
  0x62   : > { %p753_p2 = pnand %p751_p1, %p707_p3  ;;  %p759_p10 = scmp.lt.s32.totalorder %s757_s9, %s750_s6 }
  0x64   : > { %p754_p7 = pneg %p753_p2  ;;  %p760_p8 = por %p759_p10, %p758_p4 }
  0x66   : > { %p761_p11 = pnand %p760_p8, %p754_p7 }
  0x68   : > { %764 = shalt.err (!%p761_p11)
}
  0x69   : > { %609 = dma.hbm_to_vmem [thread:$0]  (!%p1007_p13), %s1014_s5, 64, %s224_s29, %s212_s30  }
  0x6a   : > { %p1167_p6 = scmp.ne.s32.totalorder %s1159_s25, 0 }
  0x6b   : > { %s1067_s10 = sand.u32 (!%p1167_p6), 1, %s839_s16   ;;  %p1168_p3 = scmp.ne.s32.totalorder (!%p1167_p6), %s1157_s23, 0 }
  0x6c   : > { %232 = sbr.rel (%p1167_p6) target bundleno = 730 (0x2da), region = 36  ;;  %s557_s2 = sshll.u32 (!%p1167_p6), %s1067_s10, 2 }
  0x6d   : > { %s235_s12 = scalar_lea.sflag (!%p1167_p6), [#allocation4], %s1067_s10  ;;  %s238_s22 = scalar_lea.vmem (!%p1167_p6), [#allocation3], %s557_s2 }
  0x73   : > { %818 = dma.done.wait (%p1168_p3), %s235_s12, 64  }
  0x74   : > { %820 = vsyncadd (%p1168_p3), %s235_s12, 4294967232  ;;  %s243_s14 = sand.u32 1, %s922_s21   ;;  %s1076_s25 = scalar_lea.vmem [#allocation6], %s557_s2 }
  0x75   : > { %s244_s5 = scalar_lea.sflag [#allocation7], %s243_s14 }
  0x76   : > { %822 = dma.done.wait (%p1168_p3), %s244_s5, 64  }
  0x77   : > { %824 = vsyncadd (%p1168_p3), %s244_s5, 4294967232  ;;  %p1169_p10 = scmp.eq.s32.totalorder %s922_s21, 0 }
  0x79   : > { %826 = dma.done.wait (%p1169_p10), [#allocation7], 256   ;;  %p1170_p13 = pmov %p1169_p10 }
  0x7a   : > { %v862_v0 = vmov 0.0   ;;  %vm863_vm0 = vmmov 0   ;;  %v673_v1 = vld [vmem:[#allocation8] sm:$0xff]   ;;  %v674_v2 = vld [vmem:[#allocation8 + $0x8] sm:$0xff]   ;;  %v286_v3 = vld [vmem:[%s238_s22] sm:$0xf]  ;;  %v347_v4 = vlaneseq }
  0x7b   : > { %828 = vsyncadd (%p1170_p13), [#allocation7], 4294967040  ;;  %575 = vmatprep.subr.bf16.mxu0 %v862_v0  ;;  %579 = vmatprep.mubr.msk.bf16.mxu0 %vm863_vm0, %v862_v0  ;;  %vm303_vm1 = vcmask 261120   ;;  %vm359_vm3 = vcmask 1043456   ;;  %v353_v14 = vld [vmem:[%s1076_s25] sm:$0xf] }
  0x7c   : > { %583 = vmatprep.subr.bf16.mxu1 %v862_v0  ;;  %585 = vmatprep.mubr.msk.bf16.mxu1 %vm863_vm0, %v862_v0  ;;  %v348_v5 = vand.u32 127, %v347_v4  ;;  %vm355_vm4 = vcmask 64512   ;;  %v864_v15 = vmov 32   ;;  %s560_s21 = sshll.u32 %s1067_s10, 3  ;;  %v565_v22 = vld [vmem:[%s1147_s3] ss:$0 sm:$0xff] }
  0x7d   : > { %576 = vmatpush3.bf16.msra.mxu0 %v673_v1  ;;  %672 = vset.pattern.permute.xlu0 %v864_v15  ;;  %s567_s30 = sshll.u32 %s847_s18, 7  ;;  %s280_s27 = scalar_lea.vmem [#allocation9], %s560_s21 }
  0x7e   : > { %577 = vmatprep.subr.bf16.mxu0 %v862_v0  ;;  %vm349_vm2 = vcmp.eq.s32.totalorder %v348_v5, 32  ;;  %s435_s8 = sshll.u32 %s280_s27, 4  ;;  %s1095_s6 = scalar_lea.hbm %s1148_s4, %s567_s30  ;;  %s1097_s8 = int_to_ptr.vmem [resolvable:$true] %s435_s8 }
  0x7f   : > { %s421_s11 = scalar_lea.sflag [#allocation5], %s1067_s10  ;;  %s765_s13 = scalar_lea.vmem %s1097_s8, 128 }
  0x80   : > { %p766_p12 = scmp.ne.s32.totalorder %s1097_s8, %s765_s13  ;;  %p1171_p0 = scmp.ne.s32.totalorder %s1165_s28, 0 }
  0x81   : > { %578 = vmatpush3.bf16.msra.mxu0 %v674_v2  ;;  %s865_s18 = smov [#allocation9]  }
  0x82   : > { %p767_p5 = pnand %p766_p12, %p1171_p0  ;;  %s769_s9 = sshll.u32 %s865_s18, 4  ;;  %s770_s9 = int_to_ptr.vmem [resolvable:$false] %s769_s9 }
  0x83   : > { %s771_s2 = scalar_lea.vmem %s770_s9, 256  ;;  %p772_p1 = scmp.lt.s32.totalorder %s1097_s8, %s770_s9 }
  0x84   : > { %580 = vmatmul.mubr.msk.bf16.vlgmr.msra.gmra.mrb[0].mxu0 %vm303_vm1, %v286_v3  ;;  %p768_p9 = pneg %p767_p5  ;;  %p773_p2 = scmp.lt.s32.totalorder %s771_s2, %s765_s13 }
  0x86   : > { %p774_p7 = por %p773_p2, %p772_p1 }
  0x88   : > { %p775_p4 = pnand %p774_p7, %p768_p9 }
 0x157   : > { %v341_v6 = vpop.f32.mrb[0].mxu0 }
 0x158   : > { %v350_v7 = vsel %vm349_vm2, 1.0, %v341_v6  ;;  %v581_v8 = vpop.f32.mrb[1].mxu0 }
 0x159   : > { %v351_v9 = vpack.c.bf16 %v350_v7, %v350_v7  ;;  %v344_v10 = vpop.f32.mrb[2].mxu0 }
 0x15a   : > { %v582_v11 = vpop.f32.mrb[3].mxu0 }
 0x15b   : > { %352 = vst [vmem:[#allocation2] sm:$0xf] %v351_v9 }
 0x162   : > { %v354_v12 = vld [vmem:[#allocation2] sm:$0xf] }
 0x163   : > { %v361_v13 = vsel %vm359_vm3, %v354_v12, 0 }
 0x164   : > { %584 = vmatpush3.bf16.msra.mxu1 %v361_v13 }
 0x167   : > { %586 = vmatmul.mubr.msk.bf16.vlgmr.msra.gmra.mrb[0].mxu1 %vm355_vm4, %v353_v14 }
 0x23a   : > { %v397_v16 = vpop.f32.mrb[0].mxu1 }
 0x23b   : > { %v403_v17 = vadd.f32 1.0, %v397_v16  ;;  %v587_v18 = vpop.f32.mrb[1].mxu1 }
 0x23c   : > { %v400_v19 = vpop.f32.mrb[2].mxu1 }
 0x23d   : > { %675 = vrcp.f32 %v403_v17  ;;  %v588_v20 = vpop.f32.mrb[3].mxu1 }
 0x247   : > { %v676_v21 = vpop.eup %675 }
 0x248   : > { %407 = vperm.xlu0 %672, %v676_v21  }
 0x2c7   : > { %v408_v23 = vpop.permute.xlu0 %407 }
 0x2c8   : > { %v410_v24 = vmul.f32 %v408_v23, %v397_v16 }
 0x2ca   : > { %v418_v25 = vadd.f32 %v565_v22, %v410_v24 }
 0x2cc   : > { %419 = vst [vmem:[%s280_s27] sm:$0xff] %v418_v25 }
 0x2cd   : > { %778 = shalt.err (!%p775_p4)
}
 0x2ce   : > { %s779_s10 = scalar_lea.hbm %s1095_s6, 128  ;;  %s783_s14 = scalar_lea.hbm %s1148_s4, 256 }
 0x2cf   : > { %p780_p8 = scmp.ne.s32.totalorder %s1095_s6, %s779_s10  ;;  %p784_p3 = scmp.lt.u32.totalorder %s1095_s6, %s1148_s4 }
 0x2d0   : > { %p785_p10 = scmp.lt.u32.totalorder %s783_s14, %s779_s10  ;;  %p787_p12 = scmp.lt.u32.totalorder %s779_s10, %s1095_s6 }
 0x2d1   : > { %p781_p11 = pnand %p780_p8, %p1171_p0 }
 0x2d2   : > { %p786_p13 = por %p785_p10, %p784_p3 }
 0x2d3   : > { %p782_p6 = pneg %p781_p11 }
 0x2d4   : > { %p788_p5 = por %p787_p12, %p786_p13 }
 0x2d6   : > { %p789_p9 = pnand %p788_p5, %p782_p6 }
 0x2d8   : > { %792 = shalt.err (!%p789_p9)
}
 0x2d9   : > { %597 = dma.vmem_to_hbm [thread:$0]  (%p1171_p0), %s1097_s8, 128, %s1095_s6, %s421_s11  }
 0x2da PF: > { %s447_s21 = sand.u32 1, %s835_s15   ;;  %p1172_p1 = scmp.ne.s32.totalorder %s1158_s24, 0 }
 0x2db   : > { %p1173_p2 = scmp.ge.s32.totalorder %s855_s20, 2  ;;  %s448_s23 = scalar_lea.sflag [#allocation5], %s447_s21 }
 0x2dd   : > { %p611_p7 = pnand %p1173_p2, %p1172_p1 }
 0x2df   : > { %830 = dma.done.wait (!%p611_p7), %s448_s23, 128  }
 0x2e0   : > { %832 = vsyncadd (!%p611_p7), %s448_s23, 4294967168  ;;  %s23_s20 = sadd.s32 1, %s855_s20   ;;  %s1174_s18 = sld [smem:[#allocation14_spill]] }
 0x2e1   : > { %p20_p4 = scmp.ge.s32.totalorder %s23_s20, 4   ;;  %s1175_s19 = sld [smem:[#allocation15_spill]] }
 0x2e2   : > { %s1176_s15 = smov %s839_s16  ;;  %s1177_s16 = smov %s843_s17 }
 0x2e3   : > { %s1178_s17 = smov %s994_s7  ;;  %22 = sbr.rel (!%p20_p4) target bundleno = 10 (0xa), region = 102 }
 0x2ea   :  { %453 = vsyncpa [#allocation4], 1 }
 0x2eb   :  { %455 = vsyncpa [#allocation4 + $0x1], 1 }
 0x2ec   :  { %456 = vsyncpa [#allocation7], 1 }
 0x2ed   :  { %458 = vsyncpa [#allocation7 + $0x1], 1 }
 0x2ee   :  { %459 = vsyncpa [#allocation5], 1 }
 0x2ef   :  { %461 = vsyncpa [#allocation5 + $0x1], 1 }

</bundles_post_ra>
